<compile_context>
chip_gen: v7x
topology: tpu7x:2x2x1
jax: 0.10.0
libtpu: 0.0.40
codegen_flags: <defaults>
</compile_context>

<pallas_src>
import functools
import math

import jax
import jax.numpy as jnp
from jax.experimental import pallas as pl
from jax.experimental.pallas import tpu as pltpu

_LANE = 128
_SUBLANE = 8


def _round_up(x, m):
    return ((x + m - 1) // m) * m


# ----------------------------------------------------------------------------
# Pallas kernel: fused encoder + reparameterize + decoder (one batch tile)
# ----------------------------------------------------------------------------
def _cmixedvae_kernel(
    x_m_ref,        # (TB, IN_P)          encoder input  [x_cat|x_ord|x_num|m_num]+pad
    cond_x_ref,     # (TB, IN_P)          conditioning   [c_cat|c_ord|c_num|c_m]+pad
    eps_ref,        # (TB, L_P)           reparameterization noise (zero-padded)
    w1_ref, b1_ref,         # (IN_P, H_P), (1, H_P)
    wenc_ref, benc_ref,     # (H_P, 2*L_P), (1, 2*L_P)   fused [fc21 | fc22]
    w3z_ref, w3c_ref, b3_ref,  # (L_P, H_P), (IN_P, H_P), (1, H_P)
    w4_ref, b4_ref,         # (H_P, OUT_P), (1, OUT_P)
    packed_ref,             # (TB, 2*L_P + OUT_P)  ->  [mu_pad | logvar_pad | out_pad]
    *, l_pad,
):
    wdt = w1_ref.dtype          # f32 or bf16 (weights only)
    f32 = jnp.float32

    x_m = x_m_ref[...]

    # encode: h1 = relu(fc1(x_m));  dropout is identity in eval mode
    # TODO(synk): training-mode dropout (random Bernoulli mask) not implemented.
    h1 = jnp.maximum(
        jnp.dot(x_m.astype(wdt), w1_ref[...], preferred_element_type=f32)
        + b1_ref[...],
        0.0,
    )

    # fused fc21|fc22 -> single GEMM; cols [0:L_P) hold mu, [L_P:2*L_P) logvar.
    enc = (jnp.dot(h1.astype(wdt), wenc_ref[...], preferred_element_type=f32)
           + benc_ref[...])
    mu = enc[:, :l_pad]          # vreg-aligned slice (l_pad is a multiple of 128)
    logvar = enc[:, l_pad:]

    # reparameterize: z = mu + eps * exp(0.5 * logvar)   (all f32 elementwise)
    # padded lanes: mu=0, logvar=0 -> std=1, eps=0 -> z=0 (and w3z pad rows are 0)
    z = mu + eps_ref[...] * jnp.exp(0.5 * logvar)

    # decode: h3 = relu(fc3([z, cond_x])); fc3 weight split -> two dots, no concat
    h3 = jnp.maximum(
        jnp.dot(z.astype(wdt), w3z_ref[...], preferred_element_type=f32)
        + jnp.dot(cond_x_ref[...].astype(wdt), w3c_ref[...], preferred_element_type=f32)
        + b3_ref[...],
        0.0,
    )
    out = (jnp.dot(h3.astype(wdt), w4_ref[...], preferred_element_type=f32)
           + b4_ref[...])

    # single lane-dense packed output; both stores are 128-lane aligned slabs
    packed_ref[:, : 2 * l_pad] = enc
    packed_ref[:, 2 * l_pad:] = out


# ----------------------------------------------------------------------------
# Parameter construction (deterministic, mimics nn.Linear default init),
# with weights pre-packed / zero-padded to aligned shapes at init time.
# ----------------------------------------------------------------------------
def _linear_init(key, fan_in, fan_out):
    bound = 1.0 / math.sqrt(fan_in)
    kw, kb = jax.random.split(key)
    w = jax.random.uniform(kw, (fan_in, fan_out), jnp.float32, -bound, bound)
    b = jax.random.uniform(kb, (1, fan_out), jnp.float32, -bound, bound)
    return w, b


def init_params(key, cat_dims, ord_dims, num_dim, latent_dim, interior_dim,
                weights_dtype=jnp.float32):
    input_dim = len(cat_dims) + len(ord_dims) + 2 * num_dim
    out_dim = sum(cat_dims) + sum(ord_dims) + num_dim
    k1, k21, k22, k3, k4 = jax.random.split(key, 5)
    w1, b1 = _linear_init(k1, input_dim, interior_dim)
    w21, b21 = _linear_init(k21, interior_dim, latent_dim)
    w22, b22 = _linear_init(k22, interior_dim, latent_dim)
    w3, b3 = _linear_init(k3, latent_dim + input_dim, interior_dim)
    w4, b4 = _linear_init(k4, interior_dim, out_dim)
    # split fc3 weight: rows [0:latent] multiply z, rows [latent:] multiply cond_x
    w3z, w3c = w3[:latent_dim, :], w3[latent_dim:, :]

    in_p = _round_up(input_dim, _LANE)
    h_p = _round_up(interior_dim, _LANE)
    l_p = _round_up(latent_dim, _LANE)
    out_p = _round_up(out_dim, _LANE)

    def pad(a, rows, cols):
        # zero padding: padded rows/cols contribute nothing -> results unchanged
        return jnp.pad(a, ((0, rows - a.shape[0]), (0, cols - a.shape[1])))

    # fused encoder weight: [w21 | w22] at 128-aligned column offsets
    wenc = jnp.zeros((h_p, 2 * l_p), jnp.float32)
    wenc = wenc.at[:interior_dim, :latent_dim].set(w21)
    wenc = wenc.at[:interior_dim, l_p:l_p + latent_dim].set(w22)
    benc = jnp.zeros((1, 2 * l_p), jnp.float32)
    benc = benc.at[:, :latent_dim].set(b21)
    benc = benc.at[:, l_p:l_p + latent_dim].set(b22)

    wd = weights_dtype  # biases stay f32 (added after the f32-accumulated dot)
    params = dict(
        w1=pad(w1, in_p, h_p).astype(wd), b1=pad(b1, 1, h_p),
        wenc=wenc.astype(wd), benc=benc,
        w3z=pad(w3z, l_p, h_p).astype(wd), w3c=pad(w3c, in_p, h_p).astype(wd),
        b3=pad(b3, 1, h_p),
        w4=pad(w4, h_p, out_p).astype(wd), b4=pad(b4, 1, out_p),
        dims=dict(input_dim=input_dim, out_dim=out_dim,
                  latent_dim=latent_dim, interior_dim=interior_dim,
                  in_p=in_p, h_p=h_p, l_p=l_p, out_p=out_p),
        # raw (unpadded, f32) weights kept only for the pure-JAX reference check
        raw=dict(w1=w1, b1=b1, w21=w21, b21=b21, w22=w22, b22=b22,
                 w3z=w3z, w3c=w3c, b3=b3, w4=w4, b4=b4),
    )
    return params


# ----------------------------------------------------------------------------
# Wrapper: forward pass matching CMixedVAE.forward semantics
# ----------------------------------------------------------------------------
def cmixedvae_forward(params, cat_dims, ord_dims, num_dim,
                      x_cat, x_ord, x_num, m_num,
                      cond_x_cat, cond_x_ord, cond_x_num, cond_m_num,
                      eps, *, batch_tile=512):
    d = params["dims"]
    latent_dim, out_dim = d["latent_dim"], d["out_dim"]
    in_p, h_p, l_p, out_p = d["in_p"], d["h_p"], d["l_p"], d["out_p"]
    w_pack = 2 * l_p + out_p

    def at_least_2d(a):
        return a[None, :] if a.ndim == 1 else a

    x_cat, x_ord, x_num, m_num = map(at_least_2d, (x_cat, x_ord, x_num, m_num))
    cond_x_cat, cond_x_ord, cond_x_num, cond_m_num = map(
        at_least_2d, (cond_x_cat, cond_x_ord, cond_x_num, cond_m_num))
    eps = at_least_2d(eps)

    # x = [x_cat, x_ord, x_num];  m = [m_num];  x_m = [x, m]
    x_m = jnp.concatenate([x_cat, x_ord, x_num, m_num], axis=-1).astype(jnp.float32)
    cond_x = jnp.concatenate([cond_x_cat, cond_x_ord, cond_x_num, cond_m_num],
                             axis=-1).astype(jnp.float32)
    eps = eps.astype(jnp.float32)

    batch = x_m.shape[0]
    # batch tile: multiple of 8 sublanes, capped so double-buffered tiles fit
    # comfortably in v7x's smaller (64 MiB phys / 32 MiB scoped) VMEM budget.
    tb = _round_up(min(batch_tile, _round_up(batch, _SUBLANE)), _SUBLANE)
    b_pad = _round_up(batch, tb)
    grid = (b_pad // tb,)

    def pad_act(a, cols):
        return jnp.pad(a, ((0, b_pad - a.shape[0]), (0, cols - a.shape[1])))

    x_m_p = pad_act(x_m, in_p)
    cond_x_p = pad_act(cond_x, in_p)
    eps_p = pad_act(eps, l_p)

    def row_spec(cols):           # batch-tiled activations
        return pl.BlockSpec((tb, cols), lambda i: (i, 0))

    def const_spec(shape):        # weights/biases: VMEM-resident across the grid
        return pl.BlockSpec(shape, lambda i: (0, 0))

    in_specs = [
        row_spec(in_p), row_spec(in_p), row_spec(l_p),
        const_spec((in_p, h_p)), const_spec((1, h_p)),
        const_spec((h_p, 2 * l_p)), const_spec((1, 2 * l_p)),
        const_spec((l_p, h_p)), const_spec((in_p, h_p)), const_spec((1, h_p)),
        const_spec((h_p, out_p)), const_spec((1, out_p)),
    ]
    out_specs = pl.BlockSpec((tb, w_pack), lambda i: (i, 0))

    args = (x_m_p, cond_x_p, eps_p,
            params["w1"], params["b1"], params["wenc"], params["benc"],
            params["w3z"], params["w3c"], params["b3"],
            params["w4"], params["b4"])

    flops = 2 * b_pad * (in_p * h_p          # fc1
                         + h_p * 2 * l_p     # fused fc21|fc22
                         + l_p * h_p         # fc3 (z part)
                         + in_p * h_p        # fc3 (cond part)
                         + h_p * out_p)      # fc4
    bytes_accessed = (sum(int(a.size) * a.dtype.itemsize for a in args)
                      + b_pad * w_pack * 4)
    cost = pl.CostEstimate(flops=flops, transcendentals=b_pad * l_p,
                           bytes_accessed=bytes_accessed)

    packed = pl.pallas_call(
        functools.partial(_cmixedvae_kernel, l_pad=l_p),
        out_shape=jax.ShapeDtypeStruct((b_pad, w_pack), jnp.float32),
        grid=grid,
        in_specs=in_specs,
        out_specs=out_specs,
        compiler_params=pltpu.CompilerParams(dimension_semantics=("parallel",)),
        cost_estimate=cost,
    )(*args)

    # Glue: slice the packed lane-dense output back into mu / logvar / recon_*
    mu = packed[:batch, :latent_dim]
    logvar = packed[:batch, l_p:l_p + latent_dim]
    out = packed[:batch, 2 * l_p:2 * l_p + out_dim]

    recon_cat, recon_ord = [], []
    off = 0
    for dc in cat_dims:
        recon_cat.append(out[:, off:off + dc])
        off += dc
    for do in ord_dims:
        recon_ord.append(out[:, off:off + do])
        off += do
    recon_num = out[:, -num_dim:]
    return (tuple(recon_cat), tuple(recon_ord), recon_num), mu, logvar


# ----------------------------------------------------------------------------
# Pure-JAX reference (unpadded f32 weights) for a sanity check
# ----------------------------------------------------------------------------
def reference_forward(raw, x_m, cond_x, eps):
    h1 = jnp.maximum(x_m @ raw["w1"] + raw["b1"], 0.0)
    mu = h1 @ raw["w21"] + raw["b21"]
    logvar = h1 @ raw["w22"] + raw["b22"]
    z = mu + eps * jnp.exp(0.5 * logvar)
    h3 = jnp.maximum(z @ raw["w3z"] + cond_x @ raw["w3c"] + raw["b3"], 0.0)
    out = h3 @ raw["w4"] + raw["b4"]
    return mu, logvar, out


if __name__ == "__main__":
    # small, module-consistent configuration
    cat_dims = [3, 4]        # 2 categorical variables
    ord_dims = [5]           # 1 ordinal variable
    num_dim = 2
    latent_dim = 8
    interior_dim = 16
    batch = 4
    # input_dim = len(cat_dims) + len(ord_dims) + 2*num_dim = 7
    # out_dim   = sum(cat_dims) + sum(ord_dims) + num_dim   = 14

    key = jax.random.PRNGKey(0)
    kp, kx, kc, ke = jax.random.split(key, 4)
    params = init_params(kp, cat_dims, ord_dims, num_dim, latent_dim, interior_dim)

    kx1, kx2, kx3, kx4 = jax.random.split(kx, 4)
    x_cat = jax.random.randint(kx1, (batch, len(cat_dims)), 1, 4).astype(jnp.float32)
    x_ord = jax.random.randint(kx2, (batch, len(ord_dims)), 1, 6).astype(jnp.float32)
    x_num = jax.random.normal(kx3, (batch, num_dim), jnp.float32)
    m_num = (jax.random.uniform(kx4, (batch, num_dim)) > 0.5).astype(jnp.float32)

    kc1, kc2, kc3, kc4 = jax.random.split(kc, 4)
    cond_x_cat = jax.random.randint(kc1, (batch, len(cat_dims)), 1, 4).astype(jnp.float32)
    cond_x_ord = jax.random.randint(kc2, (batch, len(ord_dims)), 1, 6).astype(jnp.float32)
    cond_x_num = jax.random.normal(kc3, (batch, num_dim), jnp.float32)
    cond_m_num = (jax.random.uniform(kc4, (batch, num_dim)) > 0.5).astype(jnp.float32)

    eps = jax.random.normal(ke, (batch, latent_dim), jnp.float32)

    (recon_cat, recon_ord, recon_num), mu, logvar = cmixedvae_forward(
        params, cat_dims, ord_dims, num_dim,
        x_cat, x_ord, x_num, m_num,
        cond_x_cat, cond_x_ord, cond_x_num, cond_m_num,
        eps,
    )
    jax.block_until_ready((recon_cat, recon_ord, recon_num, mu, logvar))

    # sanity check vs. pure-JAX reference (f32 path, strict tolerance)
    x_m = jnp.concatenate([x_cat, x_ord, x_num, m_num], axis=-1)
    cond_x = jnp.concatenate([cond_x_cat, cond_x_ord, cond_x_num, cond_m_num], axis=-1)
    mu_ref, logvar_ref, out_ref = reference_forward(params["raw"], x_m, cond_x, eps)
    full_out = jnp.concatenate(list(recon_cat) + list(recon_ord) + [recon_num], axis=-1)
    assert jnp.allclose(mu, mu_ref, atol=1e-5)
    assert jnp.allclose(logvar, logvar_ref, atol=1e-5)
    assert jnp.allclose(full_out, out_ref, atol=1e-5)
    assert mu.shape == (batch, latent_dim) and logvar.shape == (batch, latent_dim)
    assert recon_num.shape == (batch, num_dim)
    assert tuple(t.shape[1] for t in recon_cat) == tuple(cat_dims)
    assert tuple(t.shape[1] for t in recon_ord) == tuple(ord_dims)

    # optional bf16-weight path (v6e/v7x MXU win): same raw init, loose tolerance
    params_bf16 = init_params(kp, cat_dims, ord_dims, num_dim, latent_dim,
                              interior_dim, weights_dtype=jnp.bfloat16)
    (rc16, ro16, rn16), mu16, logvar16 = cmixedvae_forward(
        params_bf16, cat_dims, ord_dims, num_dim,
        x_cat, x_ord, x_num, m_num,
        cond_x_cat, cond_x_ord, cond_x_num, cond_m_num,
        eps,
    )
    jax.block_until_ready((rn16, mu16, logvar16))
    full_out16 = jnp.concatenate(list(rc16) + list(ro16) + [rn16], axis=-1)
    assert jnp.allclose(mu16, mu_ref, atol=5e-2, rtol=5e-2)
    assert jnp.allclose(logvar16, logvar_ref, atol=5e-2, rtol=5e-2)
    assert jnp.allclose(full_out16, out_ref, atol=5e-2, rtol=5e-2)

    print("KERNEL_OK")
</pallas_src>

<mosaic_0001>
module attributes {stable_mosaic.version = 11 : i64} {
  func.func @_cmixedvae_kernel(%arg0: i32, %arg1: memref<8x128xf32, #tpu.memory_space<vmem>>, %arg2: memref<8x128xf32, #tpu.memory_space<vmem>>, %arg3: memref<8x128xf32, #tpu.memory_space<vmem>>, %arg4: memref<128x128xf32, #tpu.memory_space<vmem>>, %arg5: memref<1x128xf32, #tpu.memory_space<vmem>>, %arg6: memref<128x256xf32, #tpu.memory_space<vmem>>, %arg7: memref<1x256xf32, #tpu.memory_space<vmem>>, %arg8: memref<128x128xf32, #tpu.memory_space<vmem>>, %arg9: memref<128x128xf32, #tpu.memory_space<vmem>>, %arg10: memref<1x128xf32, #tpu.memory_space<vmem>>, %arg11: memref<128x128xf32, #tpu.memory_space<vmem>>, %arg12: memref<1x128xf32, #tpu.memory_space<vmem>>, %arg13: memref<8x384xf32, #tpu.memory_space<vmem>>) attributes {dimension_semantics = [#tpu.dimension_semantics<parallel>], iteration_bounds = array<i64: 1>, scalar_prefetch = 0 : i64, scratch_operands = 0 : i64, tpu.core_type = #tpu.core_type<tc>, window_params = [{transform_indices = @transform_0, window_bounds = array<i64: 8, 128>}, {transform_indices = @transform_1, window_bounds = array<i64: 8, 128>}, {transform_indices = @transform_2, window_bounds = array<i64: 8, 128>}, {pipeline_mode = #tpu.pipeline_mode<synchronous>, transform_indices = @transform_3, window_bounds = array<i64: 128, 128>}, {pipeline_mode = #tpu.pipeline_mode<synchronous>, transform_indices = @transform_4, window_bounds = array<i64: 1, 128>}, {pipeline_mode = #tpu.pipeline_mode<synchronous>, transform_indices = @transform_5, window_bounds = array<i64: 128, 256>}, {pipeline_mode = #tpu.pipeline_mode<synchronous>, transform_indices = @transform_6, window_bounds = array<i64: 1, 256>}, {pipeline_mode = #tpu.pipeline_mode<synchronous>, transform_indices = @transform_7, window_bounds = array<i64: 128, 128>}, {pipeline_mode = #tpu.pipeline_mode<synchronous>, transform_indices = @transform_8, window_bounds = array<i64: 128, 128>}, {pipeline_mode = #tpu.pipeline_mode<synchronous>, transform_indices = @transform_9, window_bounds = array<i64: 1, 128>}, {pipeline_mode = #tpu.pipeline_mode<synchronous>, transform_indices = @transform_10, window_bounds = array<i64: 128, 128>}, {pipeline_mode = #tpu.pipeline_mode<synchronous>, transform_indices = @transform_11, window_bounds = array<i64: 1, 128>}, {transform_indices = @transform_12, window_bounds = array<i64: 8, 384>}]} {
    %c0 = arith.constant 0 : index
    %c0_0 = arith.constant 0 : index
    %0 = vector.load %arg1[%c0, %c0_0] : memref<8x128xf32, #tpu.memory_space<vmem>>, vector<8x128xf32>
    %c0_1 = arith.constant 0 : index
    %c0_2 = arith.constant 0 : index
    %1 = vector.load %arg4[%c0_1, %c0_2] : memref<128x128xf32, #tpu.memory_space<vmem>>, vector<128x128xf32>
    %cst = arith.constant dense<0.000000e+00> : vector<8x128xf32>
    %2 = tpu.matmul %0, %1, %cst {dimension_numbers = #tpu.dot_dimension_numbers<[1], [0], [0], [1], [0, 0, 1, 1], [], []>} : vector<8x128xf32>, vector<128x128xf32>, vector<8x128xf32> -> vector<8x128xf32>
    %c0_3 = arith.constant 0 : index
    %c0_4 = arith.constant 0 : index
    %3 = vector.load %arg5[%c0_3, %c0_4] : memref<1x128xf32, #tpu.memory_space<vmem>>, vector<1x128xf32>
    %4 = vector.broadcast %3 : vector<1x128xf32> to vector<8x128xf32>
    %5 = arith.addf %2, %4 : vector<8x128xf32>
    %cst_5 = arith.constant 0.000000e+00 : f32
    %6 = vector.broadcast %cst_5 : f32 to vector<8x128xf32>
    %7 = arith.maximumf %5, %6 : vector<8x128xf32>
    %c0_6 = arith.constant 0 : index
    %c0_7 = arith.constant 0 : index
    %8 = vector.load %arg6[%c0_6, %c0_7] : memref<128x256xf32, #tpu.memory_space<vmem>>, vector<128x256xf32>
    %cst_8 = arith.constant dense<0.000000e+00> : vector<8x256xf32>
    %9 = tpu.matmul %7, %8, %cst_8 {dimension_numbers = #tpu.dot_dimension_numbers<[1], [0], [0], [1], [0, 0, 1, 1], [], []>} : vector<8x128xf32>, vector<128x256xf32>, vector<8x256xf32> -> vector<8x256xf32>
    %c0_9 = arith.constant 0 : index
    %c0_10 = arith.constant 0 : index
    %10 = vector.load %arg7[%c0_9, %c0_10] : memref<1x256xf32, #tpu.memory_space<vmem>>, vector<1x256xf32>
    %11 = vector.broadcast %10 : vector<1x256xf32> to vector<8x256xf32>
    %12 = arith.addf %9, %11 : vector<8x256xf32>
    %13 = vector.extract_strided_slice %12 {offsets = [0, 0], sizes = [8, 128], strides = [1, 1]} : vector<8x256xf32> to vector<8x128xf32>
    %14 = vector.extract_strided_slice %12 {offsets = [0, 128], sizes = [8, 128], strides = [1, 1]} : vector<8x256xf32> to vector<8x128xf32>
    %c0_11 = arith.constant 0 : index
    %c0_12 = arith.constant 0 : index
    %15 = vector.load %arg3[%c0_11, %c0_12] : memref<8x128xf32, #tpu.memory_space<vmem>>, vector<8x128xf32>
    %cst_13 = arith.constant 5.000000e-01 : f32
    %16 = vector.broadcast %cst_13 : f32 to vector<8x128xf32>
    %17 = arith.mulf %16, %14 : vector<8x128xf32>
    %18 = math.exp %17 : vector<8x128xf32>
    %19 = arith.mulf %15, %18 : vector<8x128xf32>
    %20 = arith.addf %13, %19 : vector<8x128xf32>
    %c0_14 = arith.constant 0 : index
    %c0_15 = arith.constant 0 : index
    %21 = vector.load %arg8[%c0_14, %c0_15] : memref<128x128xf32, #tpu.memory_space<vmem>>, vector<128x128xf32>
    %cst_16 = arith.constant dense<0.000000e+00> : vector<8x128xf32>
    %22 = tpu.matmul %20, %21, %cst_16 {dimension_numbers = #tpu.dot_dimension_numbers<[1], [0], [0], [1], [0, 0, 1, 1], [], []>} : vector<8x128xf32>, vector<128x128xf32>, vector<8x128xf32> -> vector<8x128xf32>
    %c0_17 = arith.constant 0 : index
    %c0_18 = arith.constant 0 : index
    %23 = vector.load %arg2[%c0_17, %c0_18] : memref<8x128xf32, #tpu.memory_space<vmem>>, vector<8x128xf32>
    %c0_19 = arith.constant 0 : index
    %c0_20 = arith.constant 0 : index
    %24 = vector.load %arg9[%c0_19, %c0_20] : memref<128x128xf32, #tpu.memory_space<vmem>>, vector<128x128xf32>
    %cst_21 = arith.constant dense<0.000000e+00> : vector<8x128xf32>
    %25 = tpu.matmul %23, %24, %cst_21 {dimension_numbers = #tpu.dot_dimension_numbers<[1], [0], [0], [1], [0, 0, 1, 1], [], []>} : vector<8x128xf32>, vector<128x128xf32>, vector<8x128xf32> -> vector<8x128xf32>
    %26 = arith.addf %22, %25 : vector<8x128xf32>
    %c0_22 = arith.constant 0 : index
    %c0_23 = arith.constant 0 : index
    %27 = vector.load %arg10[%c0_22, %c0_23] : memref<1x128xf32, #tpu.memory_space<vmem>>, vector<1x128xf32>
    %28 = vector.broadcast %27 : vector<1x128xf32> to vector<8x128xf32>
    %29 = arith.addf %26, %28 : vector<8x128xf32>
    %cst_24 = arith.constant 0.000000e+00 : f32
    %30 = vector.broadcast %cst_24 : f32 to vector<8x128xf32>
    %31 = arith.maximumf %29, %30 : vector<8x128xf32>
    %c0_25 = arith.constant 0 : index
    %c0_26 = arith.constant 0 : index
    %32 = vector.load %arg11[%c0_25, %c0_26] : memref<128x128xf32, #tpu.memory_space<vmem>>, vector<128x128xf32>
    %cst_27 = arith.constant dense<0.000000e+00> : vector<8x128xf32>
    %33 = tpu.matmul %31, %32, %cst_27 {dimension_numbers = #tpu.dot_dimension_numbers<[1], [0], [0], [1], [0, 0, 1, 1], [], []>} : vector<8x128xf32>, vector<128x128xf32>, vector<8x128xf32> -> vector<8x128xf32>
    %c0_28 = arith.constant 0 : index
    %c0_29 = arith.constant 0 : index
    %34 = vector.load %arg12[%c0_28, %c0_29] : memref<1x128xf32, #tpu.memory_space<vmem>>, vector<1x128xf32>
    %35 = vector.broadcast %34 : vector<1x128xf32> to vector<8x128xf32>
    %36 = arith.addf %33, %35 : vector<8x128xf32>
    %c0_30 = arith.constant 0 : index
    %c0_31 = arith.constant 0 : index
    %37 = vector.load %arg13[%c0_30, %c0_31] : memref<8x384xf32, #tpu.memory_space<vmem>>, vector<8x256xf32>
    tpu.vector_store %arg13[%c0_30, %c0_31], %12 {strides = array<i32>} : memref<8x384xf32, #tpu.memory_space<vmem>>, vector<8x256xf32>,
    %c0_32 = arith.constant 0 : index
    %c256 = arith.constant 256 : index
    %38 = vector.load %arg13[%c0_32, %c256] : memref<8x384xf32, #tpu.memory_space<vmem>>, vector<8x128xf32>
    tpu.vector_store %arg13[%c0_32, %c256], %36 {strides = array<i32>} : memref<8x384xf32, #tpu.memory_space<vmem>>, vector<8x128xf32>,
    return
  }
  func.func @transform_0(%arg0: i32) -> (i32, i32) {
    %c0_i32 = arith.constant 0 : i32
    %c0_i32_0 = arith.constant 0 : i32
    return %arg0, %c0_i32 : i32, i32
  }
  func.func @transform_1(%arg0: i32) -> (i32, i32) {
    %c0_i32 = arith.constant 0 : i32
    %c0_i32_0 = arith.constant 0 : i32
    return %arg0, %c0_i32 : i32, i32
  }
  func.func @transform_2(%arg0: i32) -> (i32, i32) {
    %c0_i32 = arith.constant 0 : i32
    %c0_i32_0 = arith.constant 0 : i32
    return %arg0, %c0_i32 : i32, i32
  }
  func.func @transform_3(%arg0: i32) -> (i32, i32) {
    %c0_i32 = arith.constant 0 : i32
    %c0_i32_0 = arith.constant 0 : i32
    %c0_i32_1 = arith.constant 0 : i32
    return %c0_i32, %c0_i32_0 : i32, i32
  }
  func.func @transform_4(%arg0: i32) -> (i32, i32) {
    %c0_i32 = arith.constant 0 : i32
    %c0_i32_0 = arith.constant 0 : i32
    %c0_i32_1 = arith.constant 0 : i32
    return %c0_i32, %c0_i32_0 : i32, i32
  }
  func.func @transform_5(%arg0: i32) -> (i32, i32) {
    %c0_i32 = arith.constant 0 : i32
    %c0_i32_0 = arith.constant 0 : i32
    %c0_i32_1 = arith.constant 0 : i32
    return %c0_i32, %c0_i32_0 : i32, i32
  }
  func.func @transform_6(%arg0: i32) -> (i32, i32) {
    %c0_i32 = arith.constant 0 : i32
    %c0_i32_0 = arith.constant 0 : i32
    %c0_i32_1 = arith.constant 0 : i32
    return %c0_i32, %c0_i32_0 : i32, i32
  }
  func.func @transform_7(%arg0: i32) -> (i32, i32) {
    %c0_i32 = arith.constant 0 : i32
    %c0_i32_0 = arith.constant 0 : i32
    %c0_i32_1 = arith.constant 0 : i32
    return %c0_i32, %c0_i32_0 : i32, i32
  }
  func.func @transform_8(%arg0: i32) -> (i32, i32) {
    %c0_i32 = arith.constant 0 : i32
    %c0_i32_0 = arith.constant 0 : i32
    %c0_i32_1 = arith.constant 0 : i32
    return %c0_i32, %c0_i32_0 : i32, i32
  }
  func.func @transform_9(%arg0: i32) -> (i32, i32) {
    %c0_i32 = arith.constant 0 : i32
    %c0_i32_0 = arith.constant 0 : i32
    %c0_i32_1 = arith.constant 0 : i32
    return %c0_i32, %c0_i32_0 : i32, i32
  }
  func.func @transform_10(%arg0: i32) -> (i32, i32) {
    %c0_i32 = arith.constant 0 : i32
    %c0_i32_0 = arith.constant 0 : i32
    %c0_i32_1 = arith.constant 0 : i32
    return %c0_i32, %c0_i32_0 : i32, i32
  }
  func.func @transform_11(%arg0: i32) -> (i32, i32) {
    %c0_i32 = arith.constant 0 : i32
    %c0_i32_0 = arith.constant 0 : i32
    %c0_i32_1 = arith.constant 0 : i32
    return %c0_i32, %c0_i32_0 : i32, i32
  }
  func.func @transform_12(%arg0: i32) -> (i32, i32) {
    %c0_i32 = arith.constant 0 : i32
    %c0_i32_0 = arith.constant 0 : i32
    return %arg0, %c0_i32 : i32, i32
  }
}

</mosaic_0001>

<bundles_post_ra>
// kernel: tpu_custom_call.1
= control target key start
LH: loop header
LB: loop body
LE: loop exit
PB: predicated region body
PF: predicated region fallthrough
CT: control target
= control target key end

     0   :  { %17 = vsyncpa [#allocation3], 0  ;;  %s1500_s0 = inlined_call_operand.hbm [shape: f32[8,128], index: 0, kind: input, shape index: {}]   ;;  %s1501_s1 = inlined_call_operand.hbm [shape: f32[8,128], index: 1, kind: input, shape index: {}]   ;;  %s1502_s2 = inlined_call_operand.hbm [shape: f32[8,128], index: 2, kind: input, shape index: {}]   ;;  %s1503_s3 = inlined_call_operand.hbm [shape: f32[128,128], index: 3, kind: input, shape index: {}]   ;;  %s1504_s4 = inlined_call_operand.vmem [shape: f32[1,128], index: 4, kind: input, shape index: {}]   ;;  %s1505_s5 = inlined_call_operand.hbm [shape: f32[128,256], index: 5, kind: input, shape index: {}]   ;;  %s1506_s6 = inlined_call_operand.vmem [shape: f32[1,256], index: 6, kind: input, shape index: {}]   ;;  %s1507_s7 = inlined_call_operand.hbm [shape: f32[128,128], index: 7, kind: input, shape index: {}]   ;;  %s1508_s8 = inlined_call_operand.hbm [shape: f32[128,128], index: 8, kind: input, shape index: {}]   ;;  %s1509_s9 = inlined_call_operand.vmem [shape: f32[1,128], index: 9, kind: input, shape index: {}]   ;;  %s1510_s10 = inlined_call_operand.hbm [shape: f32[128,128], index: 10, kind: input, shape index: {}]   ;;  %s1511_s11 = inlined_call_operand.vmem [shape: f32[1,128], index: 11, kind: input, shape index: {}]   ;;  %s1512_s12 = inlined_call_operand.hbm [shape: f32[8,384], index: 12, kind: output, shape index: {}]  }
   0x1   :  { %18 = vsyncpa [#allocation6], 0 }
   0x2   :  { %19 = vsyncpa [#allocation9], 0 }
   0x3   :  { %20 = vsyncpa [#allocation12], 0 }
   0x4   :  { %21 = vsyncpa [#allocation15], 0 }
   0x5   :  { %22 = vsyncpa [#allocation4], 0  ;;  %s1225_s21 = smov [#allocation5]   ;;  %s1226_s23 = smov [#allocation8]  }
   0x6   :  { %s39_s22 = sshll.u32 %s1225_s21, 4  ;;  %s58_s24 = sshll.u32 %s1226_s23, 4  ;;  %s40_s22 = int_to_ptr.vmem [resolvable:$true] %s39_s22  ;;  %s1306_s24 = int_to_ptr.vmem [resolvable:$true] %s58_s24 }
   0x7   :  { %s1015_s27 = scalar_lea.hbm %s1501_s1, 128 }
   0x8   :  { %p1016_p0 = scmp.ne.s32.totalorder %s1501_s1, %s1015_s27  ;;  %p1019_p1 = scmp.lt.u32.totalorder %s1015_s27, %s1501_s1 }
   0xa   :  { %p1021_p2 = pnand %p1019_p1, %p1016_p0 }
   0xc   :  { %1024 = shalt.err (!%p1021_p2)
}
   0xd   :  { %s1025_s14 = scalar_lea.vmem %s40_s22, 128  ;;  %p1030_p4 = scmp.lt.s32.totalorder %s40_s22, %s40_s22 }
   0xe   :  { %p1026_p3 = scmp.ne.s32.totalorder %s40_s22, %s1025_s14  ;;  %p1031_p5 = scmp.lt.s32.totalorder %s1025_s14, %s1025_s14 }
  0x10   :  { %p1032_p6 = por %p1031_p5, %p1030_p4 }
  0x12   :  { %p1033_p7 = pnand %p1032_p6, %p1026_p3 }
  0x14   :  { %1036 = shalt.err (!%p1033_p7)
}
  0x15   :  { %42 = dma.hbm_to_vmem [thread:$0]  %s1501_s1, 128, %s40_s22, [#allocation6]  }
  0x16   :  { %s1037_s19 = scalar_lea.hbm %s1503_s3, 2048 }
  0x17   :  { %p1038_p8 = scmp.ne.s32.totalorder %s1503_s3, %s1037_s19  ;;  %p1041_p9 = scmp.lt.u32.totalorder %s1037_s19, %s1503_s3 }
  0x19   :  { %p1043_p10 = pnand %p1041_p9, %p1038_p8 }
  0x1b   :  { %1046 = shalt.err (!%p1043_p10)
}
  0x1c   :  { %s1047_s26 = scalar_lea.vmem %s1306_s24, 2048  ;;  %p1052_p12 = scmp.lt.s32.totalorder %s1306_s24, %s1306_s24 }
  0x1d   :  { %p1048_p11 = scmp.ne.s32.totalorder %s1306_s24, %s1047_s26  ;;  %p1053_p13 = scmp.lt.s32.totalorder %s1047_s26, %s1047_s26 }
  0x1f   :  { %p1054_p0 = por %p1053_p13, %p1052_p12 }
  0x21   :  { %p1055_p1 = pnand %p1054_p0, %p1048_p11 }
  0x23   :  { %1058 = shalt.err (!%p1055_p1)
}
  0x24   :  { %s1227_s1 = smov 128   ;;  %s1228_s22 = smov 8  }
  0x25   :  { %64 = dma.hbm_to_vmem [thread:$0]  %s1503_s3, 2048, %s1306_s24, [#allocation9], %s1227_s1, %s1227_s1, %s1228_s22  }
  0x26   :  { %s1229_s29 = smov [#allocation11]   ;;  %s1230_s13 = smov [#allocation2]  }
  0x27   :  { %s86_s30 = sshll.u32 %s1229_s29, 4  ;;  %s29_s14 = sshll.u32 %s1230_s13, 4  ;;  %s87_s30 = int_to_ptr.vmem [resolvable:$true] %s86_s30  ;;  %s30_s14 = int_to_ptr.vmem [resolvable:$true] %s29_s14 }
  0x28   :  { %s1059_s17 = scalar_lea.hbm %s1507_s7, 2048 }
  0x29   :  { %p1060_p2 = scmp.ne.s32.totalorder %s1507_s7, %s1059_s17  ;;  %p1063_p3 = scmp.lt.u32.totalorder %s1059_s17, %s1507_s7 }
  0x2b   :  { %p1065_p4 = pnand %p1063_p3, %p1060_p2 }
  0x2d   :  { %1068 = shalt.err (!%p1065_p4)
}
  0x2e   :  { %s1069_s3 = scalar_lea.vmem %s87_s30, 2048  ;;  %p1074_p6 = scmp.lt.s32.totalorder %s87_s30, %s87_s30 }
  0x2f   :  { %p1070_p5 = scmp.ne.s32.totalorder %s87_s30, %s1069_s3  ;;  %p1075_p7 = scmp.lt.s32.totalorder %s1069_s3, %s1069_s3 }
  0x31   :  { %p1076_p8 = por %p1075_p7, %p1074_p6 }
  0x33   :  { %p1077_p9 = pnand %p1076_p8, %p1070_p5 }
  0x35   :  { %1080 = shalt.err (!%p1077_p9)
}
  0x36   :  { %92 = dma.hbm_to_vmem [thread:$0]  %s1507_s7, 2048, %s87_s30, [#allocation12], %s1227_s1, %s1227_s1, %s1228_s22  }
  0x37   :  { %s1081_s27 = scalar_lea.hbm %s1500_s0, 128 }
  0x38   :  { %p1082_p10 = scmp.ne.s32.totalorder %s1500_s0, %s1081_s27  ;;  %p1085_p11 = scmp.lt.u32.totalorder %s1081_s27, %s1500_s0 }
  0x3a   :  { %p1087_p12 = pnand %p1085_p11, %p1082_p10 }
  0x3c   :  { %1090 = shalt.err (!%p1087_p12)
}
  0x3d   :  { %s1091_s16 = scalar_lea.vmem %s30_s14, 128  ;;  %p1096_p0 = scmp.lt.s32.totalorder %s30_s14, %s30_s14 }
  0x3e   :  { %p1092_p13 = scmp.ne.s32.totalorder %s30_s14, %s1091_s16  ;;  %p1097_p1 = scmp.lt.s32.totalorder %s1091_s16, %s1091_s16 }
  0x40   :  { %p1098_p2 = por %p1097_p1, %p1096_p0 }
  0x42   :  { %p1099_p3 = pnand %p1098_p2, %p1092_p13 }
  0x44   :  { %1102 = shalt.err (!%p1099_p3)
}
  0x45   :  { %32 = dma.hbm_to_vmem [thread:$0]  %s1500_s0, 128, %s30_s14, [#allocation3]  }
  0x46   :  { %s1231_s17 = smov [#allocation7]   ;;  %s1232_s19 = smov [#allocation10]  }
  0x47   :  { %s49_s18 = sshll.u32 %s1231_s17, 4  ;;  %s72_s20 = sshll.u32 %s1232_s19, 4  ;;  %s50_s18 = int_to_ptr.vmem [resolvable:$true] %s49_s18  ;;  %s1367_s20 = int_to_ptr.vmem [resolvable:$true] %s72_s20 }
  0x48   :  { %s1103_s24 = scalar_lea.hbm %s1502_s2, 128 }
  0x49   :  { %p1104_p4 = scmp.ne.s32.totalorder %s1502_s2, %s1103_s24  ;;  %p1107_p5 = scmp.lt.u32.totalorder %s1103_s24, %s1502_s2 }
  0x4b   :  { %p1109_p6 = pnand %p1107_p5, %p1104_p4 }
  0x4d   :  { %1112 = shalt.err (!%p1109_p6)
}
  0x4e   :  { %s1113_s0 = scalar_lea.vmem %s50_s18, 128  ;;  %p1118_p8 = scmp.lt.s32.totalorder %s50_s18, %s50_s18 }
  0x4f   :  { %p1114_p7 = scmp.ne.s32.totalorder %s50_s18, %s1113_s0  ;;  %p1119_p9 = scmp.lt.s32.totalorder %s1113_s0, %s1113_s0 }
  0x51   :  { %p1120_p10 = por %p1119_p9, %p1118_p8 }
  0x53   :  { %p1121_p11 = pnand %p1120_p10, %p1114_p7 }
  0x55   :  { %1124 = shalt.err (!%p1121_p11)
}
  0x56   :  { %52 = dma.hbm_to_vmem [thread:$0]  %s1502_s2, 128, %s50_s18, [#allocation6]  }
  0x57   :  { %s1125_s15 = scalar_lea.hbm %s1505_s5, 4096 }
  0x58   :  { %p1126_p12 = scmp.ne.s32.totalorder %s1505_s5, %s1125_s15  ;;  %p1129_p13 = scmp.lt.u32.totalorder %s1125_s15, %s1505_s5 }
  0x5a   :  { %p1131_p0 = pnand %p1129_p13, %p1126_p12 }
  0x5c   :  { %1134 = shalt.err (!%p1131_p0)
}
  0x5d   :  { %s1135_s19 = scalar_lea.vmem %s1367_s20, 4096  ;;  %p1140_p2 = scmp.lt.s32.totalorder %s1367_s20, %s1367_s20 }
  0x5e   :  { %p1136_p1 = scmp.ne.s32.totalorder %s1367_s20, %s1135_s19  ;;  %p1141_p3 = scmp.lt.s32.totalorder %s1135_s19, %s1135_s19 }
  0x60   :  { %p1142_p4 = por %p1141_p3, %p1140_p2 }
  0x62   :  { %p1143_p5 = pnand %p1142_p4, %p1136_p1 }
  0x64   :  { %1146 = shalt.err (!%p1143_p5)
}
  0x65   :  { %s1233_s2 = smov 256   ;;  %s1234_s18 = smov 16  }
  0x66   :  { %78 = dma.hbm_to_vmem [thread:$0]  %s1505_s5, 4096, %s1367_s20, [#allocation9], %s1233_s2, %s1233_s2, %s1234_s18  }
  0x67   :  { %s1235_s24 = smov [#allocation13]   ;;  %s1236_s25 = smov [#allocation14]  }
  0x68   :  { %s98_s23 = sshll.u32 %s1235_s24, 4  ;;  %s112_s26 = sshll.u32 %s1236_s25, 4  ;;  %s99_s23 = int_to_ptr.vmem [resolvable:$true] %s98_s23  ;;  %s1398_s26 = int_to_ptr.vmem [resolvable:$true] %s112_s26 }
  0x69   :  { %s1147_s14 = scalar_lea.hbm %s1508_s8, 2048 }
  0x6a   :  { %p1148_p6 = scmp.ne.s32.totalorder %s1508_s8, %s1147_s14  ;;  %p1151_p7 = scmp.lt.u32.totalorder %s1147_s14, %s1508_s8 }
  0x6c   :  { %p1153_p8 = pnand %p1151_p7, %p1148_p6 }
  0x6e   :  { %1156 = shalt.err (!%p1153_p8)
}
  0x6f   :  { %s1157_s5 = scalar_lea.vmem %s99_s23, 2048  ;;  %p1162_p10 = scmp.lt.s32.totalorder %s99_s23, %s99_s23 }
  0x70   :  { %p1158_p9 = scmp.ne.s32.totalorder %s99_s23, %s1157_s5  ;;  %p1163_p11 = scmp.lt.s32.totalorder %s1157_s5, %s1157_s5 }
  0x72   :  { %p1164_p12 = por %p1163_p11, %p1162_p10 }
  0x74   :  { %p1165_p13 = pnand %p1164_p12, %p1158_p9 }
  0x76   :  { %1168 = shalt.err (!%p1165_p13)
}
  0x77   :  { %104 = dma.hbm_to_vmem [thread:$0]  %s1508_s8, 2048, %s99_s23, [#allocation12], %s1227_s1, %s1227_s1, %s1228_s22  }
  0x78   :  { %s1169_s17 = scalar_lea.hbm %s1510_s10, 2048 }
  0x79   :  { %p1170_p0 = scmp.ne.s32.totalorder %s1510_s10, %s1169_s17  ;;  %p1173_p1 = scmp.lt.u32.totalorder %s1169_s17, %s1510_s10 }
  0x7b   :  { %p1175_p2 = pnand %p1173_p1, %p1170_p0 }
  0x7d   :  { %1178 = shalt.err (!%p1175_p2)
}
  0x7e   :  { %s1179_s3 = scalar_lea.vmem %s1398_s26, 2048  ;;  %p1184_p4 = scmp.lt.s32.totalorder %s1398_s26, %s1398_s26 }
  0x7f   :  { %p1180_p3 = scmp.ne.s32.totalorder %s1398_s26, %s1179_s3  ;;  %p1185_p5 = scmp.lt.s32.totalorder %s1179_s3, %s1179_s3 }
  0x81   :  { %p1186_p6 = por %p1185_p5, %p1184_p4 }
  0x83   :  { %p1187_p7 = pnand %p1186_p6, %p1180_p3 }
  0x85   :  { %1190 = shalt.err (!%p1187_p7)
}
  0x86   :  { %118 = dma.hbm_to_vmem [thread:$0]  %s1510_s10, 2048, %s1398_s26, [#allocation15], %s1227_s1, %s1227_s1, %s1228_s22  }
  0x87   :  { %1213 = dma.done.wait [#allocation3], 128  }
  0x88   :  { %1214 = vsyncadd [#allocation3], 4294967168 }
  0x89   :  { %1215 = dma.done.wait [#allocation6], 256  }
  0x8a   :  { %1216 = vsyncadd [#allocation6], 4294967040 }
  0x8b   :  { %1217 = dma.done.wait [#allocation9], 6144  }
  0x8c   :  { %1218 = vsyncadd [#allocation9], 4294961152 }
  0x8d   :  { %1219 = dma.done.wait [#allocation12], 4096  }
  0x8e   :  { %1220 = vsyncadd [#allocation12], 4294963200 }
  0x8f   :  { %1221 = dma.done.wait [#allocation15], 2048  }
  0x90   :  { %1222 = vsyncadd [#allocation15], 4294965248  ;;  %v1237_v0 = vmov 0.0|0.0   ;;  %vm1238_vm0 = vmmov 0   ;;  %v1239_v1 = vmov 0.0   ;;  %v146_v2 = vld [vmem:[#allocation8] sm:$0xff] }
  0x91   :  { %869 = vmatprep.subr.bf16.mxu0 %v1237_v0  ;;  %761 = vmatprep.mubr.msk.f32.mxu0 %vm1238_vm0, %v1239_v1  ;;  %v147_v3 = vld [vmem:[#allocation8 + $0x8] sm:$0xff]  ;;  %v148_v4 = vld [vmem:[#allocation8 + $0x10] sm:$0xff]  ;;  %v149_v6 = vld [vmem:[#allocation8 + $0x18] sm:$0xff]  ;;  %s1240_s27 = smov [#allocation16]  }
  0x92   :  { %348 = vmatprep.mubr.f32.mxu1 %v1239_v1  ;;  %v870_v5 = vpack.c.bf16 %v147_v3, %v146_v2  ;;  %v873_v7 = vpack.c.bf16 %v149_v6, %v148_v4  ;;  %v150_v8 = vld [vmem:[#allocation8 + $0x20] sm:$0xff]  ;;  %v151_v9 = vld [vmem:[#allocation8 + $0x28] sm:$0xff]  ;;  %v152_v11 = vld [vmem:[#allocation8 + $0x30] sm:$0xff]  ;;  %s645_s0 = sshll.u32 %s1240_s27, 4  ;;  %s646_s0 = int_to_ptr.vmem [resolvable:$true] %s645_s0 }
  0x93   :  { %v241_v10 = vld [vmem:[#allocation10 + $0x8] sm:$0xff]  ;;  %v153_v12 = vld [vmem:[#allocation8 + $0x38] sm:$0xff]  ;;  %v240_v14 = vld [vmem:[#allocation10] sm:$0xff]  ;;  %v876_v16 = vpack.c.bf16 %v151_v9, %v150_v8  ;;  %s1191_s14 = scalar_lea.vmem %s646_s0, 384  ;;  %p1196_p9 = scmp.lt.s32.totalorder %s646_s0, %s646_s0 }
  0x94   :  { %871 = vmatpush3.bf16.msra.mxu0 %v870_v5  ;;  %v243_v13 = vld [vmem:[#allocation10 + $0x18] sm:$0xff]  ;;  %v242_v15 = vld [vmem:[#allocation10 + $0x10] sm:$0xff]  ;;  %v245_v19 = vld [vmem:[#allocation10 + $0x28] sm:$0xff]  ;;  %v879_v27 = vpack.c.bf16 %v153_v12, %v152_v11  ;;  %p1192_p8 = scmp.ne.s32.totalorder %s646_s0, %s1191_s14  ;;  %p1197_p10 = scmp.lt.s32.totalorder %s1191_s14, %s1191_s14 }
  0x95   :  { %872 = vmatprep.subr.bf16.mxu0 %v1237_v0  ;;  %v893_v17 = vpack.c.bf16 %v243_v13, %v241_v10  ;;  %v895_v18 = vpack.c.bf16 %v242_v15, %v240_v14  ;;  %v247_v20 = vld [vmem:[#allocation10 + $0x38] sm:$0xff]  ;;  %v244_v21 = vld [vmem:[#allocation10 + $0x20] sm:$0xff]  ;;  %v246_v23 = vld [vmem:[#allocation10 + $0x30] sm:$0xff] }
  0x96   :  { %v897_v22 = vpack.c.bf16 %v247_v20, %v245_v19  ;;  %v249_v24 = vld [vmem:[#allocation10 + $0x48] sm:$0xff]  ;;  %v251_v25 = vld [vmem:[#allocation10 + $0x58] sm:$0xff]  ;;  %v899_v26 = vpack.c.bf16 %v246_v23, %v244_v21  ;;  %v154_v28 = vld [vmem:[#allocation8 + $0x40] sm:$0xff]  ;;  %p1198_p11 = por %p1197_p10, %p1196_p9 }
  0x97   :  { %894 = vmatprep.subr.bf16.mxu1 %v893_v17  ;;  %v901_v29 = vpack.c.bf16 %v251_v25, %v249_v24  ;;  %v248_v30 = vld [vmem:[#allocation10 + $0x40] sm:$0xff]  ;;  %v250_v31 = vld [vmem:[#allocation10 + $0x50] sm:$0xff]  ;;  %v155_v32 = vld [vmem:[#allocation8 + $0x48] sm:$0xff] }
  0x98   :  { %874 = vmatpush3.bf16.msra.mxu0 %v873_v7  ;;  %896 = vmatpush1.bf16.msra.mxu1 %v895_v18  ;;  %v253_v33 = vld [vmem:[#allocation10 + $0x68] sm:$0xff]  ;;  %v255_v34 = vld [vmem:[#allocation10 + $0x78] sm:$0xff]  ;;  %v903_v35 = vpack.c.bf16 %v250_v31, %v248_v30  ;;  %v882_v36 = vpack.c.bf16 %v155_v32, %v154_v28  ;;  %v156_v37 = vld [vmem:[#allocation8 + $0x50] sm:$0xff]  ;;  %p1199_p12 = pnand %p1198_p11, %p1192_p8 }
  0x99   :  { %875 = vmatprep.subr.bf16.mxu0 %v1237_v0  ;;  %898 = vmatprep.subr.bf16.mxu1 %v897_v22  ;;  %v905_v38 = vpack.c.bf16 %v255_v34, %v253_v33  ;;  %v252_v39 = vld [vmem:[#allocation10 + $0x60] sm:$0xff]  ;;  %v254_v40 = vld [vmem:[#allocation10 + $0x70] sm:$0xff]  ;;  %v157_v41 = vld [vmem:[#allocation8 + $0x58] sm:$0xff] }
  0x9a   :  { %v257_v42 = vld [vmem:[#allocation10 + $0x88] sm:$0xff]  ;;  %v259_v43 = vld [vmem:[#allocation10 + $0x98] sm:$0xff]  ;;  %v907_v44 = vpack.c.bf16 %v254_v40, %v252_v39  ;;  %v885_v45 = vpack.c.bf16 %v157_v41, %v156_v37  ;;  %v158_v46 = vld [vmem:[#allocation8 + $0x60] sm:$0xff] }
  0x9b   :  { %v909_v47 = vpack.c.bf16 %v259_v43, %v257_v42  ;;  %v256_v48 = vld [vmem:[#allocation10 + $0x80] sm:$0xff]  ;;  %v258_v49 = vld [vmem:[#allocation10 + $0x90] sm:$0xff]  ;;  %v159_v50 = vld [vmem:[#allocation8 + $0x68] sm:$0xff] }
  0x9c   :  { %877 = vmatpush3.bf16.msra.mxu0 %v876_v16  ;;  %900 = vmatpush1.bf16.msra.mxu1 %v899_v26  ;;  %v261_v51 = vld [vmem:[#allocation10 + $0xa8] sm:$0xff]  ;;  %v263_v52 = vld [vmem:[#allocation10 + $0xb8] sm:$0xff]  ;;  %v911_v53 = vpack.c.bf16 %v258_v49, %v256_v48  ;;  %v888_v54 = vpack.c.bf16 %v159_v50, %v158_v46  ;;  %v160_v55 = vld [vmem:[#allocation8 + $0x70] sm:$0xff] }
  0x9d   :  { %878 = vmatprep.subr.bf16.mxu0 %v1237_v0  ;;  %902 = vmatprep.subr.bf16.mxu1 %v901_v29  ;;  %v913_v56 = vpack.c.bf16 %v263_v52, %v261_v51  ;;  %v260_v57 = vld [vmem:[#allocation10 + $0xa0] sm:$0xff]  ;;  %v262_v58 = vld [vmem:[#allocation10 + $0xb0] sm:$0xff]  ;;  %v161_v59 = vld [vmem:[#allocation8 + $0x78] sm:$0xff] }
  0x9e   :  { %v265_v60 = vld [vmem:[#allocation10 + $0xc8] sm:$0xff]  ;;  %v267_v61 = vld [vmem:[#allocation10 + $0xd8] sm:$0xff]  ;;  %v915_v62 = vpack.c.bf16 %v262_v58, %v260_v57  ;;  %v891_v63 = vpack.c.bf16 %v161_v59, %v160_v55  ;;  %v264_v3 = vld [vmem:[#allocation10 + $0xc0] sm:$0xff] }
  0x9f   :  { %v917_v2 = vpack.c.bf16 %v267_v61, %v265_v60  ;;  %v266_v4 = vld [vmem:[#allocation10 + $0xd0] sm:$0xff]  ;;  %v145_v6 = vld [vmem:[#allocation2] sm:$0xff]  ;;  %v271_v8 = vld [vmem:[#allocation10 + $0xf8] sm:$0xff] }
  0xa0   :  { %880 = vmatpush3.bf16.msra.mxu0 %v879_v27  ;;  %904 = vmatpush1.bf16.msra.mxu1 %v903_v35  ;;  %v919_v5 = vpack.c.bf16 %v266_v4, %v264_v3  ;;  %v269_v7 = vld [vmem:[#allocation10 + $0xe8] sm:$0xff]  ;;  %v268_v10 = vld [vmem:[#allocation10 + $0xe0] sm:$0xff]  ;;  %v270_v11 = vld [vmem:[#allocation10 + $0xf0] sm:$0xff] }
  0xa1   :  { %881 = vmatprep.subr.bf16.mxu0 %v1237_v0  ;;  %906 = vmatprep.subr.bf16.mxu1 %v905_v38  ;;  %v921_v9 = vpack.c.bf16 %v271_v8, %v269_v7  ;;  %v923_v12 = vpack.c.bf16 %v270_v11, %v268_v10  ;;  %v378_v13 = vld [vmem:[#allocation13] sm:$0xff]  ;;  %v379_v14 = vld [vmem:[#allocation13 + $0x8] sm:$0xff]  ;;  %v380_v16 = vld [vmem:[#allocation13 + $0x10] sm:$0xff] }
  0xa2   :  { %v926_v15 = vpack.c.bf16 %v379_v14, %v378_v13  ;;  %v381_v17 = vld [vmem:[#allocation13 + $0x18] sm:$0xff]  ;;  %v382_v19 = vld [vmem:[#allocation13 + $0x20] sm:$0xff]  ;;  %v383_v20 = vld [vmem:[#allocation13 + $0x28] sm:$0xff] }
  0xa3   :  { %v929_v18 = vpack.c.bf16 %v381_v17, %v380_v16  ;;  %v932_v21 = vpack.c.bf16 %v383_v20, %v382_v19  ;;  %v658_v22 = vld [vmem:[%s1504_s4] ss:$0 sm:$0xff]  ;;  %v361_v23 = vld [vmem:[#allocation11] sm:$0xff]  ;;  %v363_v30 = vld [vmem:[#allocation11 + $0x10] sm:$0xff] }
  0xa4   :  { %883 = vmatpush3.bf16.msra.mxu0 %v882_v36  ;;  %908 = vmatpush1.bf16.msra.mxu1 %v907_v44  ;;  %v362_v24 = vld [vmem:[#allocation11 + $0x8] sm:$0xff]  ;;  %v364_v31 = vld [vmem:[#allocation11 + $0x18] sm:$0xff]  ;;  %v365_v33 = vld [vmem:[#allocation11 + $0x20] sm:$0xff] }
  0xa5   :  { %884 = vmatprep.subr.bf16.mxu0 %v1237_v0  ;;  %910 = vmatprep.subr.bf16.mxu1 %v909_v47  ;;  %v950_v28 = vpack.c.bf16 %v362_v24, %v361_v23  ;;  %v953_v32 = vpack.c.bf16 %v364_v31, %v363_v30  ;;  %v366_v34 = vld [vmem:[#allocation11 + $0x28] sm:$0xff]  ;;  %v384_v36 = vld [vmem:[#allocation13 + $0x30] sm:$0xff]  ;;  %v385_v37 = vld [vmem:[#allocation13 + $0x38] sm:$0xff] }
  0xa6   :  { %v956_v35 = vpack.c.bf16 %v366_v34, %v365_v33  ;;  %v935_v38 = vpack.c.bf16 %v385_v37, %v384_v36  ;;  %v367_v39 = vld [vmem:[#allocation11 + $0x30] sm:$0xff]  ;;  %v368_v40 = vld [vmem:[#allocation11 + $0x38] sm:$0xff]  ;;  %v386_v42 = vld [vmem:[#allocation13 + $0x40] sm:$0xff] }
  0xa7   :  { %v959_v41 = vpack.c.bf16 %v368_v40, %v367_v39  ;;  %v387_v43 = vld [vmem:[#allocation13 + $0x48] sm:$0xff]  ;;  %v388_v48 = vld [vmem:[#allocation13 + $0x50] sm:$0xff]  ;;  %v389_v49 = vld [vmem:[#allocation13 + $0x58] sm:$0xff] }
  0xa8   :  { %886 = vmatpush3.bf16.msra.mxu0 %v885_v45  ;;  %912 = vmatpush1.bf16.msra.mxu1 %v911_v53  ;;  %v938_v44 = vpack.c.bf16 %v387_v43, %v386_v42  ;;  %v369_v45 = vld [vmem:[#allocation11 + $0x40] sm:$0xff]  ;;  %v370_v46 = vld [vmem:[#allocation11 + $0x48] sm:$0xff]  ;;  %v371_v50 = vld [vmem:[#allocation11 + $0x50] sm:$0xff]  ;;  %v941_v51 = vpack.c.bf16 %v389_v49, %v388_v48 }
  0xa9   :  { %887 = vmatprep.subr.bf16.mxu0 %v1237_v0  ;;  %914 = vmatprep.subr.bf16.mxu1 %v913_v56  ;;  %v962_v47 = vpack.c.bf16 %v370_v46, %v369_v45  ;;  %v372_v52 = vld [vmem:[#allocation11 + $0x58] sm:$0xff]  ;;  %v390_v53 = vld [vmem:[#allocation13 + $0x60] sm:$0xff]  ;;  %v374_v57 = vld [vmem:[#allocation11 + $0x68] sm:$0xff] }
  0xaa   :  { %v965_v55 = vpack.c.bf16 %v372_v52, %v371_v50  ;;  %v373_v56 = vld [vmem:[#allocation11 + $0x60] sm:$0xff]  ;;  %v392_v60 = vld [vmem:[#allocation13 + $0x70] sm:$0xff]  ;;  %v393_v61 = vld [vmem:[#allocation13 + $0x78] sm:$0xff] }
  0xab   :  { %v968_v59 = vpack.c.bf16 %v374_v57, %v373_v56  ;;  %v377_v4 = vld [vmem:[#allocation5] sm:$0xff]  ;;  %v547_v11 = vld [vmem:[#allocation14 + $0x20] sm:$0xff]  ;;  %v554_v20 = vld [vmem:[#allocation14 + $0x58] sm:$0xff] }
  0xac   :  { %889 = vmatpush3.bf16.msra.mxu0 %v888_v54  ;;  %916 = vmatpush1.bf16.msra.mxu1 %v915_v62  ;;  %v391_v54 = vld [vmem:[#allocation13 + $0x68] sm:$0xff]  ;;  %v375_v62 = vld [vmem:[#allocation11 + $0x70] sm:$0xff]  ;;  %v551_v17 = vld [vmem:[#allocation14 + $0x40] sm:$0xff] }
  0xad   :  { %890 = vmatprep.subr.bf16.mxu0 %v1237_v0  ;;  %918 = vmatprep.subr.bf16.mxu1 %v917_v2  ;;  %v944_v58 = vpack.c.bf16 %v391_v54, %v390_v53  ;;  %v947_v2 = vpack.c.bf16 %v393_v61, %v392_v60  ;;  %v545_v7 = vld [vmem:[#allocation14 + $0x10] sm:$0xff]  ;;  %v555_v39 = vld [vmem:[#allocation14 + $0x60] sm:$0xff]  ;;  %v556_v40 = vld [vmem:[#allocation14 + $0x68] sm:$0xff] }
  0xae   :  { %v549_v14 = vld [vmem:[#allocation14 + $0x30] sm:$0xff]  ;;  %v558_v45 = vld [vmem:[#allocation14 + $0x78] sm:$0xff]  ;;  %v659_v48 = vld [vmem:[%s1509_s9] ss:$0 sm:$0xff] }
  0xaf   :  { %v553_v19 = vld [vmem:[#allocation14 + $0x50] sm:$0xff]  ;;  %v660_v53 = vld [vmem:[%s1511_s11] ss:$0 sm:$0xff] }
  0xb0   :  { %892 = vmatpush3.bf16.msra.mxu0 %v891_v63  ;;  %920 = vmatpush1.bf16.msra.mxu1 %v919_v5  ;;  %v376_v63 = vld [vmem:[#allocation11 + $0x78] sm:$0xff]  ;;  %v543_v5 = vld [vmem:[#allocation14] sm:$0xff] }
  0xb1   :  { %925 = vmatprep.subr.bf16.mxu0 %v1237_v0  ;;  %922 = vmatprep.subr.bf16.mxu1 %v921_v9  ;;  %v971_v3 = vpack.c.bf16 %v376_v63, %v375_v62  ;;  %v546_v9 = vld [vmem:[#allocation14 + $0x18] sm:$0xff] }
  0xb2   :  { %v977_v10 = vpack.c.bf16 %v546_v9, %v545_v7 }
  0xb3   :  { %762 = vmatmul.mubr.f32.vlgmr.msra.gmra.mrb[0].mxu0 %v145_v6  ;;  %v544_v6 = vld [vmem:[#allocation14 + $0x8] sm:$0xff] }
  0xb4   :  { %796 = vmatprep.mubr.msk.f32.mxu0 %vm1238_vm0, %v1239_v1  ;;  %924 = vmatpush1.bf16.msra.mxu1 %v923_v12  ;;  %v974_v8 = vpack.c.bf16 %v544_v6, %v543_v5  ;;  %v548_v12 = vld [vmem:[#allocation14 + $0x28] sm:$0xff] }
  0xb5   :  { %949 = vmatprep.subr.bf16.mxu1 %v1237_v0  ;;  %927 = vmatpush3.bf16.msra.mxu0 %v926_v15  ;;  %v980_v13 = vpack.c.bf16 %v548_v12, %v547_v11  ;;  %v550_v15 = vld [vmem:[#allocation14 + $0x38] sm:$0xff] }
  0xb6   :  { %928 = vmatprep.subr.bf16.mxu0 %v1237_v0  ;;  %v983_v16 = vpack.c.bf16 %v550_v15, %v549_v14 }
  0xb9   :  { %930 = vmatpush3.bf16.msra.mxu0 %v929_v18 }
  0xba   :  { %931 = vmatprep.subr.bf16.mxu0 %v1237_v0 }
  0xbd   :  { %933 = vmatpush3.bf16.msra.mxu0 %v932_v21  ;;  %v989_v21 = vpack.c.bf16 %v554_v20, %v553_v19 }
  0xbe   :  { %934 = vmatprep.subr.bf16.mxu0 %v1237_v0 }
  0xc1   :  { %936 = vmatpush3.bf16.msra.mxu0 %v935_v38 }
  0xc2   :  { %937 = vmatprep.subr.bf16.mxu0 %v1237_v0 }
  0xc5   :  { %939 = vmatpush3.bf16.msra.mxu0 %v938_v44  ;;  %v557_v44 = vld [vmem:[#allocation14 + $0x70] sm:$0xff] }
  0xc6   :  { %940 = vmatprep.subr.bf16.mxu0 %v1237_v0  ;;  %v995_v46 = vpack.c.bf16 %v558_v45, %v557_v44 }
  0xc9   :  { %942 = vmatpush3.bf16.msra.mxu0 %v941_v51 }
  0xca   :  { %943 = vmatprep.subr.bf16.mxu0 %v1237_v0 }
  0xcd   :  { %945 = vmatpush3.bf16.msra.mxu0 %v944_v58 }
  0xce   :  { %946 = vmatprep.subr.bf16.mxu0 %v1237_v0 }
  0xd1   :  { %948 = vmatpush3.bf16.msra.mxu0 %v947_v2 }
  0xd2   :  { %973 = vmatprep.subr.bf16.mxu0 %v1237_v0 }
  0xd4   :  { %797 = vmatmul.mubr.f32.vlgmr.msra.gmra.mrb[2].mxu0 %v377_v4 }
  0xd5   :  { %866 = vmatprep.mubr.msk.f32.mxu0 %vm1238_vm0, %v1239_v1  ;;  %975 = vmatpush3.bf16.msra.mxu0 %v974_v8 }
  0xd6   :  { %976 = vmatprep.subr.bf16.mxu0 %v1237_v0 }
  0xd9   :  { %978 = vmatpush3.bf16.msra.mxu0 %v977_v10 }
  0xda   :  { %979 = vmatprep.subr.bf16.mxu0 %v1237_v0 }
  0xdd   :  { %981 = vmatpush3.bf16.msra.mxu0 %v980_v13 }
  0xde   :  { %982 = vmatprep.subr.bf16.mxu0 %v1237_v0 }
  0xe1   :  { %984 = vmatpush3.bf16.msra.mxu0 %v983_v16 }
  0xe2   :  { %985 = vmatprep.subr.bf16.mxu0 %v1237_v0 }
 0x186   :  { %v235_v25 = vpop.f32.mrb[0].mxu0 }
 0x187   :  { %v236_v26 = vadd.f32 %v658_v22, %v235_v25  ;;  %v763_v27 = vpop.f32.mrb[1].mxu0  ;;  %v274_v22 = vlaneseq  ;;  %v272_v25 = vld [vmem:[%s1506_s6] sm:$0x3] }
 0x189   :  { %v239_v29 = vmax.f32 %v236_v26, 0.0  ;;  %v275_v23 = vshrl.u32 %v274_v22, 7 }
 0x18b   :  { %349 = vmatmul.mubr.f32.vlgmr.msra.gmra.mrb[0].mxu1 %v239_v29  ;;  %v276_v24 = vsub.s32 0, %v275_v23  ;;  %v280_v26 = vsub.s32 1, %v275_v23 }
 0x18c   :  { %951 = vmatpush3.bf16.msra.mxu1 %v950_v28  ;;  %831 = vmatprep.mubr.msk.f32.mxu1 %vm1238_vm0, %v1239_v1  ;;  %v552_v1 = vld [vmem:[#allocation14 + $0x48] sm:$0xff] }
 0x18d   :  { %952 = vmatprep.subr.bf16.mxu1 %v1237_v0  ;;  %v986_v18 = vpack.c.bf16 %v552_v1, %v551_v17  ;;  %v277_v27 = vrot.slane %v272_v25, %v276_v24  ;;  %v281_v28 = vrot.slane %v272_v25, %v280_v26 }
 0x18f   :  { %987 = vmatpush3.bf16.msra.mxu0 %v986_v18 }
 0x190   :  { %954 = vmatpush3.bf16.msra.mxu1 %v953_v32  ;;  %988 = vmatprep.subr.bf16.mxu0 %v1237_v0 }
 0x191   :  { %955 = vmatprep.subr.bf16.mxu1 %v1237_v0 }
 0x193   :  { %990 = vmatpush3.bf16.msra.mxu0 %v989_v21 }
 0x194   :  { %957 = vmatpush3.bf16.msra.mxu1 %v956_v35  ;;  %991 = vmatprep.subr.bf16.mxu0 %v1237_v0  ;;  %v355_v35 = vld [vmem:[#allocation7] sm:$0xff] }
 0x195   :  { %958 = vmatprep.subr.bf16.mxu1 %v1237_v0 }
 0x198   :  { %960 = vmatpush3.bf16.msra.mxu1 %v959_v41  ;;  %v992_v41 = vpack.c.bf16 %v556_v40, %v555_v39 }
 0x199   :  { %961 = vmatprep.subr.bf16.mxu1 %v1237_v0 }
 0x19a   :  { %993 = vmatpush3.bf16.msra.mxu0 %v992_v41 }
 0x19b   :  { %994 = vmatprep.subr.bf16.mxu0 %v1237_v0 }
 0x19c   :  { %963 = vmatpush3.bf16.msra.mxu1 %v962_v47 }
 0x19d   :  { %964 = vmatprep.subr.bf16.mxu1 %v1237_v0 }
 0x19e   :  { %996 = vmatpush3.bf16.msra.mxu0 %v995_v46 }
 0x1a0   :  { %966 = vmatpush3.bf16.msra.mxu1 %v965_v55 }
 0x1a1   :  { %967 = vmatprep.subr.bf16.mxu1 %v1237_v0 }
 0x1a4   :  { %969 = vmatpush3.bf16.msra.mxu1 %v968_v59 }
 0x1a5   :  { %970 = vmatprep.subr.bf16.mxu1 %v1237_v0 }
 0x1a7   :  { %v460_v42 = vpop.f32.mrb[2].mxu0 }
 0x1a8   :  { %972 = vmatpush3.bf16.msra.mxu1 %v971_v3  ;;  %v798_v43 = vpop.f32.mrb[3].mxu0 }
 0x25e   :  { %v350_v29 = vpop.f32.mrb[0].mxu1 }
 0x25f   :  { %v351_v30 = vadd.f32 %v350_v29, %v277_v27  ;;  %v352_v31 = vpop.f32.mrb[1].mxu1 }
 0x260   :  { %v353_v32 = vadd.f32 %v352_v31, %v281_v28 }
 0x261   :  { %636 = vst [vmem:[#allocation16] sm:$0xff] %v351_v30 }
 0x262   :  { %v356_v33 = vmul.f32 0.5, %v353_v32  ;;  %637 = vst [vmem:[#allocation16 + $0x8] sm:$0xff] %v353_v32 }
 0x264   :  { %v357_v34 = vmul.f32 1.442695, %v356_v33 }
 0x266   :  { %1013 = vpow2.f32 %v357_v34 }
 0x270   :  { %v1014_v36 = vpop.eup %1013 }
 0x271   :  { %v359_v37 = vmul.f32 %v1014_v36, %v355_v35 }
 0x273   :  { %v360_v38 = vadd.f32 %v359_v37, %v351_v30 }
 0x275   :  { %832 = vmatmul.mubr.f32.vlgmr.msra.gmra.mrb[2].mxu1 %v360_v38 }
 0x348   :  { %v530_v47 = vpop.f32.mrb[2].mxu1 }
 0x349   :  { %v531_v49 = vadd.f32 %v530_v47, %v460_v42  ;;  %v833_v50 = vpop.f32.mrb[3].mxu1 }
 0x34b   :  { %v541_v51 = vadd.f32 %v659_v48, %v531_v49 }
 0x34d   :  { %v542_v52 = vmax.f32 %v541_v51, 0.0 }
 0x34f   :  { %867 = vmatmul.mubr.f32.vlgmr.msra.gmra.mrb[4].mxu0 %v542_v52 }
 0x422   :  { %v632_v0 = vpop.f32.mrb[4].mxu0 }
 0x423   :  { %v633_v54 = vadd.f32 %v660_v53, %v632_v0  ;;  %v868_v55 = vpop.f32.mrb[5].mxu0 }
 0x425   :  { %638 = vst [vmem:[#allocation16 + $0x10] sm:$0xff] %v633_v54 }
 0x426   :  { %1202 = shalt.err (!%p1199_p12)
}
 0x427   :  { %s1203_s29 = scalar_lea.hbm %s1512_s12, 384 }
 0x428   :  { %p1204_p13 = scmp.ne.s32.totalorder %s1512_s12, %s1203_s29  ;;  %p1207_p0 = scmp.lt.u32.totalorder %s1203_s29, %s1512_s12 }
 0x42a   :  { %p1209_p1 = pnand %p1207_p0, %p1204_p13 }
 0x42c   :  { %1212 = shalt.err (!%p1209_p1)
}
 0x42d   :  { %648 = dma.vmem_to_hbm [thread:$0]  %s646_s0, 384, %s1512_s12, [#allocation4]  }
 0x42e   :  { %1223 = dma.done.wait [#allocation4], 384  }
 0x42f   :  { %1224 = vsyncadd [#allocation4], 4294966912 }
 0x430   :  { %652 = vsyncpa [#allocation3], 1 }
 0x431   :  { %653 = vsyncpa [#allocation6], 1 }
 0x432   :  { %654 = vsyncpa [#allocation9], 1 }
 0x433   :  { %655 = vsyncpa [#allocation12], 1 }
 0x434   :  { %656 = vsyncpa [#allocation15], 1 }
 0x435   :  { %657 = vsyncpa [#allocation4], 1 }

</bundles_post_ra>
